<compile_context>
chip_gen: v7x
topology: tpu7x:2x2x1
jax: 0.10.0
libtpu: 0.0.40
codegen_flags: <defaults>
</compile_context>

<pallas_src>
import functools

import jax
import jax.numpy as jnp
from jax import lax
from jax.experimental import pallas as pl
from jax.experimental.pallas import tpu as pltpu


# ------------------------------------------------------------------ kernels
def _contig_kernel(scale_ref, cache_ref, out_ref, *, is_fp8):
    """Copy (and optionally fp8-dequant) one lane-dense (tb, block_size*hidden) tile."""
    x = cache_ref[...]
    if is_fp8:
        # torch.ops.hpu.cast_from_fp8(out, scale_inv, bf16) == bf16(f32(fp8) * scale_inv)
        x = (x.astype(jnp.float32) * scale_ref[0]).astype(jnp.bfloat16)
    out_ref[...] = x


def _gather_kernel(blocks_ref, scale_ref, cache_hbm, out_ref, stage_ref, sem,
                   *, gpb, n, is_fp8, unroll):
    """Gather `gpb` cache blocks per grid step via batched manual DMAs.

    blocks_ref : (n,) int32 in SMEM (scalar-prefetched block ids)
    cache_hbm  : (num_blocks, block_size, hidden) ref left in HBM (pl.ANY)
    out_ref    : (gpb, block_size, hidden) pipelined VMEM output tile
    stage_ref  : (2, gpb, block_size, hidden) double-buffered VMEM staging
    sem        : DMA semaphores, one per staging slot
    """
    i = pl.program_id(0)
    nsteps = pl.num_programs(0)
    last_row = n - 1

    def issue(step, slot):
        base = step * gpb

        def body(g, carry):
            # Tail clamp instead of per-copy pl.when guards: rows >= n redundantly
            # re-fetch blocks[n-1]; the pipelined writeback clips them anyway.
            row = jnp.minimum(base + g, last_row)
            blk = blocks_ref[row]
            pltpu.make_async_copy(cache_hbm.at[blk],
                                  stage_ref.at[slot, g],
                                  sem.at[slot]).start()
            return carry

        lax.fori_loop(0, gpb, body, 0, unroll=unroll)

    # Prime slot 0.  Safe because the grid axis is "arbitrary" (sequential on one
    # core), so step 0 always runs before any other step.
    @pl.when(i == 0)
    def _():
        issue(0, 0)

    # Step-ahead prefetch: issue next step's gather DMAs into the other slot
    # before draining / consuming the current one (block ids already in SMEM).
    @pl.when(i + 1 < nsteps)
    def _():
        issue(i + 1, (i + 1) % 2)

    # Drain the slot we are about to consume.  Every in-flight copy on this slot's
    # semaphore is exactly one cache block, so gpb identical-size waits drain them.
    slot = i % 2

    def drain(g, carry):
        pltpu.make_async_copy(cache_hbm.at[0], stage_ref.at[slot, 0],
                              sem.at[slot]).wait()
        return carry

    lax.fori_loop(0, gpb, drain, 0, unroll=unroll)

    x = stage_ref[slot]
    if is_fp8:
        x = (x.astype(jnp.float32) * scale_ref[0]).astype(jnp.bfloat16)
    out_ref[...] = x


# ------------------------------------------------------------------ tiling helpers
def _choose_contig_tile(n, d, in_bytes, out_bytes, vmem_budget_bytes):
    """Tile height for the contiguous copy/dequant kernel from a VMEM byte budget."""
    bytes_per_row = d * (in_bytes + out_bytes) * 2      # x2: double-buffered pipeline
    tb = max(1, vmem_budget_bytes // bytes_per_row)
    tb = min(tb, (n + 1) // 2)                          # >=2 grid steps (v7x: 2 TCs)
    if tb >= 32:
        tb = (tb // 32) * 32                            # fp8 packs 32 / bf16 packs 16 sublanes
    elif tb >= 8:
        tb = (tb // 8) * 8
    else:
        tb = n                                          # full first dim is always legal
    return max(1, min(tb, n))


def _choose_gather_batch(n, block_bytes, staging_budget_bytes=512 * 1024,
                         max_batch=256):
    gpb = max(1, min(max_batch, staging_budget_bytes // max(block_bytes, 1)))
    return max(1, min(gpb, n))


# ------------------------------------------------------------------ wrapper
def fetch_from_cache(cache, blocks, *, scale_inv=1.0, contiguous=True,
                     vmem_budget_bytes=12 * 1024 * 1024,
                     gather_batch=None, _force_pallas=False):
    """Pallas implementation of FetchFromCache.forward(cache, blocks)."""
    num_blocks, block_size, hidden = cache.shape
    n = int(blocks.shape[0])
    is_fp8 = cache.dtype == jnp.dtype(jnp.float8_e4m3fn)
    out_dtype = jnp.bfloat16 if is_fp8 else cache.dtype
    d = block_size * hidden
    scale = jnp.asarray([scale_inv], dtype=jnp.float32)   # runtime scalar -> SMEM

    if n == 0:
        return jnp.zeros((0, block_size, hidden), out_dtype)

    # ---- contiguous path: out = cache[:n] (+ optional fp8 dequant) ----------
    if contiguous:
        n = min(n, num_blocks)          # torch-style clamped prefix slice
        if not is_fp8 and not _force_pallas:
            # Pure prefix copy: a plain slice beats any explicit kernel.
            return cache[:n]
        # TODO(synk): on v5e (no bf16 VPU, fp8 emulated) a fused XLA dequant of the
        # slice is already at roofline; gate this Pallas path per-generation if needed.
        cache2d = cache.reshape(num_blocks, d)    # lane-dense: one wide lane dim
        tb = _choose_contig_tile(n, d, cache.dtype.itemsize,
                                 jnp.dtype(out_dtype).itemsize, vmem_budget_bytes)
        out2d = pl.pallas_call(
            functools.partial(_contig_kernel, is_fp8=is_fp8),
            out_shape=jax.ShapeDtypeStruct((n, d), out_dtype),
            grid=(pl.cdiv(n, tb),),
            in_specs=[pl.BlockSpec(memory_space=pltpu.MemorySpace.SMEM),  # scale_inv
                      pl.BlockSpec((tb, d), lambda i: (i, 0))],
            out_specs=pl.BlockSpec((tb, d), lambda i: (i, 0)),
            compiler_params=pltpu.CompilerParams(
                dimension_semantics=("parallel",)),
        )(scale, cache2d)
        return out2d.reshape(n, block_size, hidden)

    # ---- gather path: out = cache.index_select(0, blocks) -------------------
    block_bytes = d * cache.dtype.itemsize
    gpb = (_choose_gather_batch(n, block_bytes) if gather_batch is None
           else max(1, min(int(gather_batch), n)))
    unroll = int(min(8, gpb))
    return pl.pallas_call(
        functools.partial(_gather_kernel, gpb=gpb, n=n, is_fp8=is_fp8,
                          unroll=unroll),
        out_shape=jax.ShapeDtypeStruct((n, block_size, hidden), out_dtype),
        grid_spec=pltpu.PrefetchScalarGridSpec(
            num_scalar_prefetch=1,                                        # block ids -> SMEM
            grid=(pl.cdiv(n, gpb),),
            in_specs=[pl.BlockSpec(memory_space=pltpu.MemorySpace.SMEM),  # scale_inv
                      pl.BlockSpec(memory_space=pl.ANY)],                 # cache stays in HBM
            out_specs=pl.BlockSpec((gpb, block_size, hidden),
                                   lambda i, blk: (i, 0, 0)),
            scratch_shapes=[
                pltpu.VMEM((2, gpb, block_size, hidden), cache.dtype),    # double-buffer stage
                pltpu.SemaphoreType.DMA((2,)),                            # one sem per slot
            ]),
        # "arbitrary": the cross-step prefetch (slot-0 prime at step 0, issue i+1 at
        # step i) requires sequential grid execution on one core.
        compiler_params=pltpu.CompilerParams(dimension_semantics=("arbitrary",)),
    )(blocks.astype(jnp.int32), scale, cache)


class FetchFromCache:
    """Thin wrapper mirroring the torch.nn.Module interface."""

    def __init__(self, scale_inv):
        self.scale_inv = scale_inv

    def __call__(self, cache, blocks, contiguous=True, **kwargs):
        return fetch_from_cache(cache, blocks, scale_inv=self.scale_inv,
                                contiguous=contiguous, **kwargs)


if __name__ == "__main__":
    key = jax.random.PRNGKey(0)
    k_cache, k_perm = jax.random.split(key)

    num_blocks, block_size, hidden = 64, 8, 128
    cache = jax.random.normal(
        k_cache, (num_blocks, block_size, hidden), dtype=jnp.float32
    ).astype(jnp.bfloat16)
    perm = jax.random.permutation(k_perm, num_blocks).astype(jnp.int32)

    module = FetchFromCache(scale_inv=1.0)

    # 1) Default path (VLLM_CONTIGUOUS_PA=true): contiguous prefix -> plain slice bypass.
    blocks_a = perm[:24]
    out_a = jax.block_until_ready(module(cache, blocks_a, contiguous=True))
    assert out_a.shape == (24, block_size, hidden)
    assert jnp.array_equal(out_a, cache[:24])

    # 2) Same contiguous semantics through the tiled Pallas copy kernel (tb is capped
    #    at cdiv(24,2) -> 8, so 3 lane-dense (8, 1024) grid steps) -- validates the
    #    fp8-dequant path's tiling/grid on bf16 data.
    out_b = jax.block_until_ready(
        fetch_from_cache(cache, blocks_a, contiguous=True, _force_pallas=True))
    assert jnp.array_equal(out_b, cache[:24])

    # 3) Gather path (index_select), 3 full DMA batches of 8 -> exercises the
    #    double-buffered staging + step-ahead prefetch across multiple grid steps.
    out_c = jax.block_until_ready(
        module(cache, blocks_a, contiguous=False, gather_batch=8))
    assert out_c.shape == (24, block_size, hidden)
    assert jnp.array_equal(out_c, jnp.take(cache, blocks_a, axis=0))

    # 4) Gather path with a partial last batch (n=20, batch=8 -> 3 steps, last has 4
    #    valid rows; the rest are clamp-gathered and clipped on writeback).
    blocks_d = perm[:20]
    out_d = jax.block_until_ready(
        module(cache, blocks_d, contiguous=False, gather_batch=8))
    assert jnp.array_equal(out_d, jnp.take(cache, blocks_d, axis=0))

    # 5) Gather path with the auto (byte-budget) batch: gpb = n -> single grid step,
    #    exercises the prime-only / no-prefetch control-flow branch.
    out_e = jax.block_until_ready(module(cache, blocks_a, contiguous=False))
    assert jnp.array_equal(out_e, jnp.take(cache, blocks_a, axis=0))

    # TODO(synk): the float8_e4m3fn + scale_inv dequant branches are implemented in both
    # kernels but not exercised here; fp8 input support is TPU-generation dependent.

    print("KERNEL_OK")
</pallas_src>

<mosaic_0001>
module attributes {stable_mosaic.version = 11 : i64} {
  func.func @_contig_kernel(%arg0: i32, %arg1: memref<1xf32, #tpu.memory_space<smem>>, %arg2: memref<8x1024xbf16, #tpu.memory_space<vmem>>, %arg3: memref<8x1024xbf16, #tpu.memory_space<vmem>>) attributes {dimension_semantics = [#tpu.dimension_semantics<parallel>], iteration_bounds = array<i64: 3>, scalar_prefetch = 0 : i64, scratch_operands = 0 : i64, tpu.core_type = #tpu.core_type<tc>, window_params = [{transform_indices = @transform_0, window_bounds = array<i64: 1>}, {transform_indices = @transform_1, window_bounds = array<i64: 8, 1024>}, {transform_indices = @transform_2, window_bounds = array<i64: 8, 1024>}]} {
    %c0 = arith.constant 0 : index
    %c0_0 = arith.constant 0 : index
    %0 = vector.load %arg2[%c0, %c0_0] : memref<8x1024xbf16, #tpu.memory_space<vmem>>, vector<8x1024xbf16>
    %c0_1 = arith.constant 0 : index
    %c0_2 = arith.constant 0 : index
    %1 = vector.load %arg3[%c0_1, %c0_2] : memref<8x1024xbf16, #tpu.memory_space<vmem>>, vector<8x1024xbf16>
    tpu.vector_store %arg3[%c0_1, %c0_2], %0 {strides = array<i32>} : memref<8x1024xbf16, #tpu.memory_space<vmem>>, vector<8x1024xbf16>,
    return
  }
  func.func @transform_0(%arg0: i32) -> i32 {
    %c0_i32 = arith.constant 0 : i32
    %c0_i32_0 = arith.constant 0 : i32
    return %c0_i32 : i32
  }
  func.func @transform_1(%arg0: i32) -> (i32, i32) {
    %c0_i32 = arith.constant 0 : i32
    %c0_i32_0 = arith.constant 0 : i32
    return %arg0, %c0_i32 : i32, i32
  }
  func.func @transform_2(%arg0: i32) -> (i32, i32) {
    %c0_i32 = arith.constant 0 : i32
    %c0_i32_0 = arith.constant 0 : i32
    return %arg0, %c0_i32 : i32, i32
  }
}

</mosaic_0001>

<bundles_post_ra>
// kernel: tpu_custom_call.1
= control target key start
LH: loop header
LB: loop body
LE: loop exit
PB: predicated region body
PF: predicated region fallthrough
CT: control target
= control target key end

     0   :  { %8 = vsyncpa [#allocation4], 0  ;;  %s590_s0 = inlined_call_operand.<no memory space> [shape: f32[1], index: 0, kind: input, shape index: {}]   ;;  %s591_s1 = inlined_call_operand.hbm [shape: bf16[64,1024], index: 1, kind: input, shape index: {}]   ;;  %s592_s2 = inlined_call_operand.hbm [shape: bf16[24,1024], index: 2, kind: output, shape index: {}]  }
   0x1   :  { %10 = vsyncpa [#allocation4 + $0x1], 0 }
   0x2   :  { %11 = vsyncpa [#allocation5], 0 }
   0x3   :  { %13 = vsyncpa [#allocation5 + $0x1], 0  ;;  %s431_s9 = smov 0   ;;  %s433_s10 = smov 0  }
   0x4   :  { %s435_s11 = smov 0   ;;  %s437_s12 = smov 0  }
   0x5 LB: > { %s452_s0 = sadd.s32 4294967295, %s412_s12   ;;  %s254_s13 = sadd.s32 4294967294, %s412_s12   ;;  %s412_s12 = sphi %s437_s12, %s606_s12   ;;  %s408_s11 = sphi %s435_s11, %s605_s11   ;;  %s404_s10 = sphi %s433_s10, %s604_s10   ;;  %s400_s9 = sphi %s431_s9, %s603_s9  }
   0x6   : > { %s456_s14 = sadd.s32 1, %s412_s12   ;;  %s47_s15 = sadd.s32 1, %s408_s11 }
   0x7   : > { %s44_s16 = ssub.s32 %s412_s12, %s456_s14  ;;  %p54_p0 = scmp.ne.s32.totalorder %s408_s11, %s404_s10 }
   0x8   : > { %p45_p1 = scmp.eq.s32.totalorder %s44_s16, 0  ;;  %p55_p2 = scmp.eq.s32.totalorder %s412_s12, 0 }
   0x9   : > { %p60_p3 = scmp.ne.s32.totalorder %s404_s10, %s400_s9  ;;  %p61_p4 = scmp.eq.s32.totalorder %s452_s0, 0 }
   0xa   : > { %s468_s17 = scalar_select %p45_p1, %s408_s11, %s47_s15  }
   0xb   : > { %p470_p5 = por %p55_p2, %p54_p0  ;;  %p474_p6 = por %p61_p4, %p60_p3 }
   0xc   : > { %p84_p7 = scmp.eq.s32.totalorder %s452_s0, 2  ;;  %p90_p8 = scmp.eq.s32.totalorder %s254_s13, 2 }
   0xd   : > { %p282_p9 = scmp.lt.s32.totalorder %s412_s12, 3  ;;  %s113_s22 = sand.u32 1, %s408_s11  }
   0xe   : > { %p480_p10 = por %p84_p7, %p54_p0  ;;  %p484_p11 = por %p90_p8, %p60_p3 }
   0xf   : > { %s268_s23 = sshll.u32 %s412_s12, 9  ;;  %s257_s24 = sshll.u32 %s113_s22, 5 }
  0x10   : > { %s596_s20 = scalar_select %p480_p10, 1, 0 }
  0x11   : > { %s597_s21 = scalar_select %p484_p11, 1, 0 }
  0x12   : > { %s493_s27 = scalar_lea.hbm %s591_s1, %s268_s23  ;;  %s117_s28 = scalar_lea.vmem [#allocation3], %s257_s24 }
  0x13   : > { %s125_s29 = sshll.u32 %s117_s28, 4  ;;  %p497_p12 = pnand %p282_p9, %p470_p5  ;;  %s501_s29 = int_to_ptr.vmem [resolvable:$true] %s125_s29 }
  0x14   : > { %s114_s3 = scalar_lea.sflag [#allocation4], %s113_s22  ;;  %s316_s4 = scalar_lea.hbm %s493_s27, 512 }
  0x15   : > { %p317_p1 = scmp.ne.s32.totalorder %s493_s27, %s316_s4  ;;  %p318_p2 = pneg %p497_p12 }
  0x16   : > { %s321_s7 = scalar_lea.hbm %s591_s1, 4096  ;;  %p322_p5 = scmp.lt.u32.totalorder %s493_s27, %s591_s1 }
  0x17   : > { %p319_p3 = pnand %p318_p2, %p317_p1  ;;  %p323_p7 = scmp.lt.u32.totalorder %s321_s7, %s316_s4 }
  0x18   : > { %p325_p9 = scmp.lt.u32.totalorder %s316_s4, %s493_s27 }
  0x19   : > { %p320_p4 = pneg %p319_p3  ;;  %p324_p8 = por %p323_p7, %p322_p5 }
  0x1b   : > { %p326_p13 = por %p325_p9, %p324_p8 }
  0x1d   : > { %p327_p0 = pnand %p326_p13, %p320_p4 }
  0x1f   : > { %330 = shalt.err (!%p327_p0)
}
  0x20   : > { %s331_s15 = scalar_lea.vmem %s501_s29, 512  ;;  %s414_s16 = smov [#allocation3]  }
  0x21   : > { %p332_p1 = scmp.ne.s32.totalorder %s501_s29, %s331_s15  ;;  %s336_s18 = sshll.u32 %s414_s16, 4  ;;  %s337_s18 = int_to_ptr.vmem [resolvable:$false] %s336_s18 }
  0x22   : > { %s338_s22 = scalar_lea.vmem %s337_s18, 1024  ;;  %p339_p10 = scmp.lt.s32.totalorder %s501_s29, %s337_s18 }
  0x23   : > { %p334_p3 = pnand %p332_p1, %p318_p2  ;;  %p340_p5 = scmp.lt.s32.totalorder %s338_s22, %s331_s15 }
  0x25   : > { %p335_p11 = pneg %p334_p3  ;;  %p341_p7 = por %p340_p5, %p339_p10 }
  0x27   : > { %p342_p8 = pnand %p341_p7, %p335_p11 }
  0x29   : > { %345 = shalt.err (!%p342_p8)
}
  0x2a   : > { %277 = dma.hbm_to_vmem [thread:$0]  (!%p497_p12), %s493_s27, 512, %s501_s29, %s114_s3  }
  0x2b   : > { %p599_p13 = scmp.lt.s32.totalorder %s412_s12, 4  ;;  %p600_p0 = scmp.ge.s32.totalorder %s412_s12, 1 }
  0x2d   : > { %p131_p2 = pnand %p600_p0, %p599_p13 }
  0x2e   : > { %s535_s23 = sand.u32 (!%p131_p2), 1, %s404_s10  }
  0x2f   : > { %134 = sbr.rel (%p131_p2) target bundleno = 81 (0x51), region = 28  ;;  %s261_s24 = sshll.u32 (!%p131_p2), %s535_s23, 5 }
  0x30   : > { %s137_s25 = scalar_lea.sflag (!%p131_p2), [#allocation4], %s535_s23  ;;  %s140_s26 = scalar_lea.vmem (!%p131_p2), [#allocation3], %s261_s24 }
  0x36   : > { %391 = dma.done.wait (%p474_p6), %s137_s25, 512  }
  0x37   : > { %393 = vsyncadd (%p474_p6), %s137_s25, 4294966784  ;;  %s160_s27 = scalar_lea.vmem [#allocation6], %s261_s24  ;;  %s269_s29 = sshll.u32 %s452_s0, 9  ;;  %v161_v0 = vld [vmem:[%s140_s26] sm:$0xff]  ;;  %v162_v1 = vld [vmem:[%s140_s26 + $0x8] sm:$0xff] }
  0x38   : > { %s184_s28 = sshll.u32 %s160_s27, 4  ;;  %v163_v2 = vld [vmem:[%s140_s26 + $0x10] sm:$0xff]  ;;  %s549_s4 = scalar_lea.hbm %s592_s2, %s269_s29  ;;  %165 = vst [vmem:[%s160_s27] sm:$0xff] %v161_v0  ;;  %166 = vst [vmem:[%s160_s27 + $0x8] sm:$0xff] %v162_v1  ;;  %v164_v3 = vld [vmem:[%s140_s26 + $0x18] sm:$0xff]  ;;  %s544_s28 = int_to_ptr.vmem [resolvable:$true] %s184_s28 }
  0x39   : > { %167 = vst [vmem:[%s160_s27 + $0x10] sm:$0xff] %v163_v2  ;;  %168 = vst [vmem:[%s160_s27 + $0x18] sm:$0xff] %v164_v3  ;;  %s170_s19 = scalar_lea.sflag [#allocation5], %s535_s23  ;;  %s346_s0 = scalar_lea.vmem %s544_s28, 512 }
  0x3a   : > { %p347_p6 = scmp.ne.s32.totalorder %s544_s28, %s346_s0  ;;  %p601_p10 = scmp.ne.s32.totalorder %s596_s20, 0 }
  0x3b   : > { %s415_s5 = smov [#allocation6]  }
  0x3c   : > { %p348_p11 = pnand %p347_p6, %p601_p10  ;;  %s350_s6 = sshll.u32 %s415_s5, 4  ;;  %s351_s6 = int_to_ptr.vmem [resolvable:$false] %s350_s6 }
  0x3d   : > { %s352_s7 = scalar_lea.vmem %s351_s6, 1024  ;;  %p353_p4 = scmp.lt.s32.totalorder %s544_s28, %s351_s6 }
  0x3e   : > { %p349_p12 = pneg %p348_p11  ;;  %p354_p9 = scmp.lt.s32.totalorder %s352_s7, %s346_s0 }
  0x40   : > { %p355_p1 = por %p354_p9, %p353_p4 }
  0x42   : > { %p356_p3 = pnand %p355_p1, %p349_p12 }
  0x44   : > { %359 = shalt.err (!%p356_p3)
}
  0x45   : > { %s360_s8 = scalar_lea.hbm %s549_s4, 512  ;;  %s364_s16 = scalar_lea.hbm %s592_s2, 1536 }
  0x46   : > { %p361_p5 = scmp.ne.s32.totalorder %s549_s4, %s360_s8  ;;  %p365_p13 = scmp.lt.u32.totalorder %s549_s4, %s592_s2 }
  0x47   : > { %p366_p0 = scmp.lt.u32.totalorder %s364_s16, %s360_s8  ;;  %p368_p6 = scmp.lt.u32.totalorder %s360_s8, %s549_s4 }
  0x48   : > { %p362_p7 = pnand %p361_p5, %p601_p10 }
  0x49   : > { %p367_p2 = por %p366_p0, %p365_p13 }
  0x4a   : > { %p363_p8 = pneg %p362_p7 }
  0x4b   : > { %p369_p11 = por %p368_p6, %p367_p2 }
  0x4d   : > { %p370_p12 = pnand %p369_p11, %p363_p8 }
  0x4f   : > { %373 = shalt.err (!%p370_p12)
}
  0x50   : > { %272 = dma.vmem_to_hbm [thread:$0]  (%p601_p10), %s544_s28, 512, %s549_s4, %s170_s19  }
  0x51 PF: > { %p283_p4 = scmp.ge.s32.totalorder %s412_s12, 2  ;;  %s196_s23 = sand.u32 1, %s400_s9  }
  0x52   : > { %p602_p9 = scmp.ne.s32.totalorder %s597_s21, 0  ;;  %s197_s24 = scalar_lea.sflag [#allocation5], %s196_s23 }
  0x54   : > { %p279_p1 = pnand %p283_p4, %p602_p9 }
  0x56   : > { %395 = dma.done.wait (!%p279_p1), %s197_s24, 512  }
  0x57   : > { %397 = vsyncadd (!%p279_p1), %s197_s24, 4294966784  ;;  %p16_p3 = scmp.ge.s32.totalorder %s456_s14, 5   ;;  %s603_s9 = smov %s404_s10 }
  0x58   : > { %s604_s10 = smov %s408_s11  ;;  %s605_s11 = smov %s468_s17 }
  0x59   : > { %s606_s12 = smov %s456_s14  ;;  %18 = sbr.rel (!%p16_p3) target bundleno = 5 (0x5), region = 73 }
  0x60   :  { %202 = vsyncpa [#allocation4], 1 }
  0x61   :  { %204 = vsyncpa [#allocation4 + $0x1], 1 }
  0x62   :  { %205 = vsyncpa [#allocation5], 1 }
  0x63   :  { %207 = vsyncpa [#allocation5 + $0x1], 1 }

</bundles_post_ra>
